<compile_context>
chip_gen: v5e
topology: v5e:2x2
jax: 0.10.0
libtpu: 0.0.40
codegen_flags: <defaults>
</compile_context>

<pallas_src>
import numpy as np
import jax
import jax.numpy as jnp
from jax.experimental import pallas as pl
from jax.experimental.pallas import tpu as pltpu


_LANE = 128          # lane width
_ORDER_PAD = 8       # IIR state dimension padded to one sublane group
_TIME_BLOCK = 128    # time samples per MXU block


def _round_up(x, m):
    return ((x + m - 1) // m) * m


# ----------------------------------------------------------------------------
# Butterworth lowpass coefficients (numpy re-implementation of scipy.signal.butter,
# btype='lowpass', analog=False) -- deterministic host-side parameter setup.
# ----------------------------------------------------------------------------
def butter_lowpass(order, normal_cutoff):
    m = np.arange(-order + 1, order, 2)
    p = -np.exp(1j * np.pi * m / (2 * order))      # analog prototype poles
    k = 1.0
    fs = 2.0
    warped = 2.0 * fs * np.tan(np.pi * normal_cutoff / fs)
    # lowpass-to-lowpass frequency transform
    p = warped * p
    k = k * warped ** order
    # bilinear transform
    fs2 = 2.0 * fs
    pz = (fs2 + p) / (fs2 - p)
    zz = -np.ones(order)
    kz = k * np.real(1.0 / np.prod(fs2 - p))
    b = kz * np.real(np.poly(zz))
    a = np.real(np.poly(pz))                        # a[0] == 1.0
    return b, a


# ----------------------------------------------------------------------------
# Host precompute: block state-space matrices for the DF2T IIR recursion.
#
#   DF2T:  y[n]     = b0 x[n] + z0[n]
#          z_i[n+1] = (b_{i+1} - a_{i+1} b0) x[n] - a_{i+1} z0[n] + z_{i+1}[n]
#
#   Over a block of Tb samples:
#          y_blk      = L @ x_blk + S @ state
#          state_next = P @ state + G @ x_blk
#
# responsivity is folded into L and G so the kernel never scales x explicitly.
# ----------------------------------------------------------------------------
def _block_ssm_matrices(b, a, tb, order_pad, responsivity):
    b = np.asarray(b, np.float64)
    a = np.asarray(a, np.float64)
    order = len(a) - 1

    L = np.zeros((tb, tb), np.float64)
    S = np.zeros((tb, order_pad), np.float64)
    P = np.zeros((order_pad, order_pad), np.float64)
    G = np.zeros((order_pad, tb), np.float64)

    if order == 0:
        np.fill_diagonal(L, b[0])
    else:
        A = np.zeros((order, order), np.float64)
        A[:, 0] = -a[1:]
        for i in range(order - 1):
            A[i, i + 1] = 1.0
        Bv = b[1:] - a[1:] * b[0]

        # impulse response h[0..tb-1]:  h[0] = b0,  h[m] = (A^{m-1} B)[0]
        h = np.zeros(tb, np.float64)
        h[0] = b[0]
        v = Bv.copy()
        for m in range(1, tb):
            h[m] = v[0]
            v = A @ v

        idx = np.arange(tb)
        dm = idx[:, None] - idx[None, :]
        L = np.where(dm >= 0, h[np.clip(dm, 0, tb - 1)], 0.0)

        # S[k, :order] = row 0 of A^k ;  P = A^tb
        Ak = np.eye(order)
        for k in range(tb):
            S[k, :order] = Ak[0]
            Ak = A @ Ak
        P[:order, :order] = Ak

        # G[:order, j] = A^{tb-1-j} @ B
        w = Bv.copy()
        for j in range(tb - 1, -1, -1):
            G[:order, j] = w
            w = A @ w

    L = L * responsivity
    G = G * responsivity
    return (L.astype(np.float32), S.astype(np.float32),
            P.astype(np.float32), G.astype(np.float32))


# ----------------------------------------------------------------------------
# Pallas kernel: per (F-tile, time-block) grid step.
#   x_ref:  (2, Tb, TILE_F) if square else (Tb, TILE_F)
#   o_ref:  (Tb, TILE_F)
#   state_ref (VMEM scratch, persists across the time axis): (ORDER_PAD, TILE_F)
# ----------------------------------------------------------------------------
def _make_kernel(square):
    hi = jax.lax.Precision.HIGHEST

    def kernel(L_ref, S_ref, P_ref, G_ref, x_ref, o_ref, state_ref):
        # Zero the carried IIR state at the start of each F-tile's time sweep.
        @pl.when(pl.program_id(1) == 0)
        def _():
            state_ref[...] = jnp.zeros_like(state_ref)

        # Optical power detection (responsivity is folded into L and G).
        if square:
            xb = x_ref[0] ** 2 + x_ref[1] ** 2          # (Tb, TILE_F)
        else:
            xb = x_ref[...]

        s = state_ref[...]                              # (ORDER_PAD, TILE_F), old state

        y = (jnp.dot(L_ref[...], xb,
                     preferred_element_type=jnp.float32, precision=hi)
             + jnp.dot(S_ref[...], s,
                       preferred_element_type=jnp.float32, precision=hi))

        state_ref[...] = (
            jnp.dot(P_ref[...], s,
                    preferred_element_type=jnp.float32, precision=hi)
            + jnp.dot(G_ref[...], xb,
                      preferred_element_type=jnp.float32, precision=hi))

        o_ref[...] = y.astype(o_ref.dtype)              # written exactly once

    return kernel


# ----------------------------------------------------------------------------
# Wrapper (mirrors LowpassDetector.forward)
# ----------------------------------------------------------------------------
def lowpass_detect(signal,
                   bitrate=40e9,
                   samplerate=160e9,
                   cutoff_frequency=20e9,
                   filter_order=4,
                   responsivity=1.0,
                   time_block=_TIME_BLOCK,
                   max_f_tile=1024):
    signal = jnp.asarray(signal, jnp.float32)
    filter_order = int(filter_order + 0.5)
    responsivity = float(responsivity)

    normal_cutoff = 2.0 * cutoff_frequency / samplerate
    if normal_cutoff > 1.0:
        raise ValueError(
            "The samplerate of the signal is smaller than the nyquist frequency "
            "[=2 x cutoff_frequency]\n%.2e < %.2e" % (samplerate, 2 * cutoff_frequency)
        )

    # photontorch convention: leading dim of size 2 means (real, imag) -> power
    square = (signal.shape[0] == 2)
    core_shape = signal.shape[1:] if square else signal.shape
    T = int(core_shape[0])
    F = int(np.prod(core_shape[1:])) if len(core_shape) > 1 else 1
    # NOTE: for best VPU/DMA utilization, batch independent signals so F >= 1024.

    x = signal.reshape((2, T, F)) if square else signal.reshape((T, F))

    if normal_cutoff == 1.0:
        # no filtering: identity filter (responsivity still applied via L)
        b, a = np.array([1.0]), np.array([1.0])
    else:
        b, a = butter_lowpass(filter_order, normal_cutoff)

    # ---- layout: pad time to a multiple of the block size (causal filter -> trailing
    #      zero-padding is harmless), pad channels to full 128-wide lanes.
    tb = min(int(time_block), _round_up(T, 8))
    T_pad = _round_up(T, tb)
    F_pad = _round_up(F, _LANE)
    tile_f = _LANE
    for cand in (1024, 512, 256, 128):
        if cand <= max_f_tile and F_pad % cand == 0:
            tile_f = cand
            break
    # Per-step VMEM: ~(3*tb*tile_f + 2*tb*tile_f)*4B double-buffered -> a few MiB at
    # tb=128, tile_f=1024; well under scoped limits on v5e/v6e/v7x, so no
    # vmem_limit_bytes override is needed.

    pad_t = T_pad - T
    pad_f = F_pad - F
    if square:
        x = jnp.pad(x, ((0, 0), (0, pad_t), (0, pad_f)))
        x_spec = pl.BlockSpec((2, tb, tile_f), lambda f, t: (0, t, f))
    else:
        x = jnp.pad(x, ((0, pad_t), (0, pad_f)))
        x_spec = pl.BlockSpec((tb, tile_f), lambda f, t: (t, f))

    L, S, P, G = _block_ssm_matrices(b, a, tb, _ORDER_PAD, responsivity)
    L, S, P, G = (jnp.asarray(L), jnp.asarray(S), jnp.asarray(P), jnp.asarray(G))

    grid = (F_pad // tile_f, T_pad // tb)

    def const_spec(shape):
        # full-array block, constant index -> DMA'd once, stays resident
        return pl.BlockSpec(shape, lambda f, t: (0, 0))

    y = pl.pallas_call(
        _make_kernel(square),
        out_shape=jax.ShapeDtypeStruct((T_pad, F_pad), jnp.float32),
        grid_spec=pltpu.PrefetchScalarGridSpec(
            num_scalar_prefetch=0,
            grid=grid,
            in_specs=[const_spec((tb, tb)),
                      const_spec((tb, _ORDER_PAD)),
                      const_spec((_ORDER_PAD, _ORDER_PAD)),
                      const_spec((_ORDER_PAD, tb)),
                      x_spec],
            out_specs=pl.BlockSpec((tb, tile_f), lambda f, t: (t, f)),
            scratch_shapes=[pltpu.VMEM((_ORDER_PAD, tile_f), jnp.float32)],
        ),
        compiler_params=pltpu.CompilerParams(
            dimension_semantics=("parallel", "arbitrary")),
    )(L, S, P, G, x)

    y = y[:T, :F]
    return y.reshape(core_shape)


# ----------------------------------------------------------------------------
# Pure-numpy float64 reference (sequential DF2T lfilter) for correctness check
# ----------------------------------------------------------------------------
def _ref_forward(signal_np, responsivity, b, a):
    if signal_np.shape[0] == 2:
        sig = signal_np[0] ** 2 + signal_np[1] ** 2
    else:
        sig = signal_np
    sig = responsivity * sig.astype(np.float64)
    T = sig.shape[0]
    flat = sig.reshape(T, -1)
    order = len(a) - 1
    y = np.zeros_like(flat)
    z = [np.zeros(flat.shape[1]) for _ in range(order)]
    for n in range(T):
        xn = flat[n]
        yn = b[0] * xn + z[0]
        for i in range(order):
            nxt = z[i + 1] if (i + 1) < order else 0.0
            z[i] = b[i + 1] * xn - a[i + 1] * yn + nxt
        y[n] = yn
    return y.reshape(sig.shape)


if __name__ == "__main__":
    key = jax.random.PRNGKey(0)
    b, a = butter_lowpass(4, 2.0 * 20e9 / 160e9)

    # primary case: photontorch convention (2, time, detectors, batch), single block
    T, C, B = 64, 4, 8
    signal = jax.random.uniform(key, (2, T, C, B), dtype=jnp.float32)
    out = lowpass_detect(signal)
    out = jax.block_until_ready(out)
    ref = _ref_forward(np.asarray(signal), 1.0, b, a)
    assert out.shape == (T, C, B)
    np.testing.assert_allclose(np.asarray(out), ref, rtol=1e-4, atol=1e-5)

    # secondary check: longer signal exercising the cross-block state carry
    T2 = 200
    signal2 = jax.random.uniform(jax.random.PRNGKey(1), (2, T2, C, B), dtype=jnp.float32)
    out2 = jax.block_until_ready(lowpass_detect(signal2))
    ref2 = _ref_forward(np.asarray(signal2), 1.0, b, a)
    np.testing.assert_allclose(np.asarray(out2), ref2, rtol=1e-4, atol=1e-5)

    print("KERNEL_OK")
</pallas_src>

<mosaic_0001>
module attributes {stable_mosaic.version = 11 : i64} {
  func.func @kernel(%arg0: i32, %arg1: i32, %arg2: memref<64x64xf32, #tpu.memory_space<vmem>>, %arg3: memref<64x8xf32, #tpu.memory_space<vmem>>, %arg4: memref<8x8xf32, #tpu.memory_space<vmem>>, %arg5: memref<8x64xf32, #tpu.memory_space<vmem>>, %arg6: memref<2x64x128xf32, #tpu.memory_space<vmem>>, %arg7: memref<64x128xf32, #tpu.memory_space<vmem>>, %arg8: memref<8x128xf32, #tpu.memory_space<vmem>>) attributes {dimension_semantics = [#tpu.dimension_semantics<parallel>, #tpu.dimension_semantics<arbitrary>], iteration_bounds = array<i64: 1, 1>, scalar_prefetch = 0 : i64, scratch_operands = 1 : i64, tpu.core_type = #tpu.core_type<tc>, window_params = [{pipeline_mode = #tpu.pipeline_mode<synchronous>, transform_indices = @transform_0, window_bounds = array<i64: 64, 64>}, {pipeline_mode = #tpu.pipeline_mode<synchronous>, transform_indices = @transform_1, window_bounds = array<i64: 64, 8>}, {pipeline_mode = #tpu.pipeline_mode<synchronous>, transform_indices = @transform_2, window_bounds = array<i64: 8, 8>}, {pipeline_mode = #tpu.pipeline_mode<synchronous>, transform_indices = @transform_3, window_bounds = array<i64: 8, 64>}, {transform_indices = @transform_4, window_bounds = array<i64: 2, 64, 128>}, {transform_indices = @transform_5, window_bounds = array<i64: 64, 128>}]} {
    %c0_i32 = arith.constant 0 : i32
    %0 = arith.cmpi eq, %arg1, %c0_i32 : i32
    %1 = arith.extui %0 : i1 to i32
    %c0_i32_0 = arith.constant 0 : i32
    %2 = arith.cmpi ne, %1, %c0_i32_0 : i32
    scf.if %2 {
      %cst_22 = arith.constant 0.000000e+00 : f32
      %23 = vector.broadcast %cst_22 : f32 to vector<8x128xf32>
      %c0_23 = arith.constant 0 : index
      %c0_24 = arith.constant 0 : index
      %24 = vector.load %arg8[%c0_23, %c0_24] : memref<8x128xf32, #tpu.memory_space<vmem>>, vector<8x128xf32>
      tpu.vector_store %arg8[%c0_23, %c0_24], %23 {strides = array<i32>} : memref<8x128xf32, #tpu.memory_space<vmem>>, vector<8x128xf32>,
    } else {
    }
    %c0 = arith.constant 0 : index
    %c0_1 = arith.constant 0 : index
    %c0_2 = arith.constant 0 : index
    %3 = vector.load %arg6[%c0, %c0_1, %c0_2] : memref<2x64x128xf32, #tpu.memory_space<vmem>>, vector<1x64x128xf32>
    %4 = vector.shape_cast %3 : vector<1x64x128xf32> to vector<64x128xf32>
    %5 = arith.mulf %4, %4 : vector<64x128xf32>
    %c1 = arith.constant 1 : index
    %c0_3 = arith.constant 0 : index
    %c0_4 = arith.constant 0 : index
    %6 = vector.load %arg6[%c1, %c0_3, %c0_4] : memref<2x64x128xf32, #tpu.memory_space<vmem>>, vector<1x64x128xf32>
    %7 = vector.shape_cast %6 : vector<1x64x128xf32> to vector<64x128xf32>
    %8 = arith.mulf %7, %7 : vector<64x128xf32>
    %9 = arith.addf %5, %8 : vector<64x128xf32>
    %c0_5 = arith.constant 0 : index
    %c0_6 = arith.constant 0 : index
    %10 = vector.load %arg8[%c0_5, %c0_6] : memref<8x128xf32, #tpu.memory_space<vmem>>, vector<8x128xf32>
    %c0_7 = arith.constant 0 : index
    %c0_8 = arith.constant 0 : index
    %11 = vector.load %arg2[%c0_7, %c0_8] : memref<64x64xf32, #tpu.memory_space<vmem>>, vector<64x64xf32>
    %cst = arith.constant dense<0.000000e+00> : vector<64x128xf32>
    %12 = tpu.matmul %11, %9, %cst {dimension_numbers = #tpu.dot_dimension_numbers<[1], [0], [0], [1], [0, 0, 1, 1], [], []>, precision = #tpu.contract_precision<fp32>} : vector<64x64xf32>, vector<64x128xf32>, vector<64x128xf32> -> vector<64x128xf32>
    %c0_9 = arith.constant 0 : index
    %c0_10 = arith.constant 0 : index
    %13 = vector.load %arg3[%c0_9, %c0_10] : memref<64x8xf32, #tpu.memory_space<vmem>>, vector<64x8xf32>
    %cst_11 = arith.constant dense<0.000000e+00> : vector<64x128xf32>
    %14 = tpu.matmul %13, %10, %cst_11 {dimension_numbers = #tpu.dot_dimension_numbers<[1], [0], [0], [1], [0, 0, 1, 1], [], []>, precision = #tpu.contract_precision<fp32>} : vector<64x8xf32>, vector<8x128xf32>, vector<64x128xf32> -> vector<64x128xf32>
    %15 = arith.addf %12, %14 : vector<64x128xf32>
    %c0_12 = arith.constant 0 : index
    %c0_13 = arith.constant 0 : index
    %16 = vector.load %arg4[%c0_12, %c0_13] : memref<8x8xf32, #tpu.memory_space<vmem>>, vector<8x8xf32>
    %cst_14 = arith.constant dense<0.000000e+00> : vector<8x128xf32>
    %17 = tpu.matmul %16, %10, %cst_14 {dimension_numbers = #tpu.dot_dimension_numbers<[1], [0], [0], [1], [0, 0, 1, 1], [], []>, precision = #tpu.contract_precision<fp32>} : vector<8x8xf32>, vector<8x128xf32>, vector<8x128xf32> -> vector<8x128xf32>
    %c0_15 = arith.constant 0 : index
    %c0_16 = arith.constant 0 : index
    %18 = vector.load %arg5[%c0_15, %c0_16] : memref<8x64xf32, #tpu.memory_space<vmem>>, vector<8x64xf32>
    %cst_17 = arith.constant dense<0.000000e+00> : vector<8x128xf32>
    %19 = tpu.matmul %18, %9, %cst_17 {dimension_numbers = #tpu.dot_dimension_numbers<[1], [0], [0], [1], [0, 0, 1, 1], [], []>, precision = #tpu.contract_precision<fp32>} : vector<8x64xf32>, vector<64x128xf32>, vector<8x128xf32> -> vector<8x128xf32>
    %20 = arith.addf %17, %19 : vector<8x128xf32>
    %c0_18 = arith.constant 0 : index
    %c0_19 = arith.constant 0 : index
    %21 = vector.load %arg8[%c0_18, %c0_19] : memref<8x128xf32, #tpu.memory_space<vmem>>, vector<8x128xf32>
    tpu.vector_store %arg8[%c0_18, %c0_19], %20 {strides = array<i32>} : memref<8x128xf32, #tpu.memory_space<vmem>>, vector<8x128xf32>,
    %c0_20 = arith.constant 0 : index
    %c0_21 = arith.constant 0 : index
    %22 = vector.load %arg7[%c0_20, %c0_21] : memref<64x128xf32, #tpu.memory_space<vmem>>, vector<64x128xf32>
    tpu.vector_store %arg7[%c0_20, %c0_21], %15 {strides = array<i32>} : memref<64x128xf32, #tpu.memory_space<vmem>>, vector<64x128xf32>,
    return
  }
  func.func @transform_0(%arg0: i32, %arg1: i32) -> (i32, i32) {
    %c0_i32 = arith.constant 0 : i32
    %c0_i32_0 = arith.constant 0 : i32
    %c0_i32_1 = arith.constant 0 : i32
    return %c0_i32, %c0_i32_0 : i32, i32
  }
  func.func @transform_1(%arg0: i32, %arg1: i32) -> (i32, i32) {
    %c0_i32 = arith.constant 0 : i32
    %c0_i32_0 = arith.constant 0 : i32
    %c0_i32_1 = arith.constant 0 : i32
    return %c0_i32, %c0_i32_0 : i32, i32
  }
  func.func @transform_2(%arg0: i32, %arg1: i32) -> (i32, i32) {
    %c0_i32 = arith.constant 0 : i32
    %c0_i32_0 = arith.constant 0 : i32
    %c0_i32_1 = arith.constant 0 : i32
    return %c0_i32, %c0_i32_0 : i32, i32
  }
  func.func @transform_3(%arg0: i32, %arg1: i32) -> (i32, i32) {
    %c0_i32 = arith.constant 0 : i32
    %c0_i32_0 = arith.constant 0 : i32
    %c0_i32_1 = arith.constant 0 : i32
    return %c0_i32, %c0_i32_0 : i32, i32
  }
  func.func @transform_4(%arg0: i32, %arg1: i32) -> (i32, i32, i32) {
    %c0_i32 = arith.constant 0 : i32
    %c0_i32_0 = arith.constant 0 : i32
    return %c0_i32, %arg1, %arg0 : i32, i32, i32
  }
  func.func @transform_5(%arg0: i32, %arg1: i32) -> (i32, i32) {
    %c0_i32 = arith.constant 0 : i32
    return %arg1, %arg0 : i32, i32
  }
}

</mosaic_0001>

<bundles_post_ra>
// kernel: tpu_custom_call.1
= control target key start
LH: loop header
LB: loop body
LE: loop exit
PB: predicated region body
PF: predicated region fallthrough
CT: control target
= control target key end

     0   :  { %10 = vsyncpa [#allocation4], 0  ;;  %s2031_s0 = inlined_call_operand.vmem [shape: f32[64,64], index: 0, kind: input, shape index: {}]   ;;  %s2032_s1 = inlined_call_operand.vmem [shape: f32[64,8], index: 1, kind: input, shape index: {}]   ;;  %s2033_s2 = inlined_call_operand.vmem [shape: f32[8,8], index: 2, kind: input, shape index: {}]   ;;  %s2034_s3 = inlined_call_operand.hbm [shape: f32[8,64], index: 3, kind: input, shape index: {}]   ;;  %s2035_s4 = inlined_call_operand.hbm [shape: f32[2,64,128], index: 4, kind: input, shape index: {}]   ;;  %s2036_s5 = inlined_call_operand.hbm [shape: f32[64,128], index: 5, kind: output, shape index: {}]  }
   0x1   :  { %11 = vsyncpa [#allocation7], 0 }
   0x2   :  { %12 = vsyncpa [#allocation5], 0  ;;  %s24_s20 = sshll.u32 %s2034_s3, 4  ;;  %s1485_s21 = smov [#allocation3]   ;;  %s25_s20 = int_to_ptr.hbm [resolvable:$true] %s24_s20 }
   0x3   :  { %s26_s22 = sshll.u32 %s1485_s21, 4  ;;  %s34_s25 = sshll.u32 %s2035_s4, 4  ;;  %s27_s22 = int_to_ptr.vmem [resolvable:$true] %s26_s22  ;;  %s35_s25 = int_to_ptr.hbm [resolvable:$true] %s34_s25 }
   0x4   :  { %29 = dma.hbm_to_vmem [thread:$0]  %s25_s20, 128, %s27_s22, [#allocation4]  }
   0x5   :  { %s1486_s26 = smov [#allocation6]   ;;  %s1487_s28 = smov 128  }
   0x6   :  { %s36_s27 = sshll.u32 %s1486_s26, 4  ;;  %s1488_s29 = smov 8   ;;  %s37_s27 = int_to_ptr.vmem [resolvable:$true] %s36_s27 }
   0x7   :  { %42 = dma.hbm_to_vmem [thread:$0]  %s35_s25, 2048, %s37_s27, [#allocation7], %s1487_s28, %s1487_s28, %s1488_s29  }
   0x8   :  { %1479 = dma.done.wait [#allocation4], 128  }
   0x9   :  { %1480 = vsyncadd [#allocation4], 4294967168 }
   0xa   :  { %1481 = dma.done.wait [#allocation7], 2048  }
   0xb   :  { %1482 = vsyncadd [#allocation7], 4294965248  ;;  %v1489_v0 = vmov 0.0   ;;  %vm114_vm0 = vcmask 64512   ;;  %v106_v1 = vld [vmem:[%s2032_s1] sm:$0xff]  ;;  %v107_v7 = vld [vmem:[%s2032_s1 + $0x8] sm:$0xff] }
   0xc   :  { %292 = vmatpush.msra.mxu2 %v1489_v0  ;;  %155 = vmatpush.msra.mxu0 %v1489_v0  ;;  %v63_v2 = vld [vmem:[#allocation6 + $0x38] sm:$0xff]  ;;  %v116_v4 = vsel %vm114_vm0, %v106_v1, 0  ;;  %v62_v8 = vld [vmem:[#allocation6 + $0x30] sm:$0xff]  ;;  %v119_v11 = vsel %vm114_vm0, %v107_v7, 0  ;;  %v108_v14 = vld [vmem:[%s2032_s1 + $0x10] sm:$0xff]  ;;  %vm502_vm1 = vcmask 523264  }
   0xd   :  { %350 = vmatpush.msra.mxu3 %v1489_v0  ;;  %241 = vmatpush.msra.mxu1 %v1489_v0  ;;  %v80_v3 = vld [vmem:[#allocation6 + $0x78] sm:$0xff]  ;;  %v71_v5 = vmul.f32 %v63_v2, %v63_v2  ;;  %v79_v9 = vld [vmem:[#allocation6 + $0x70] sm:$0xff]  ;;  %v1543_v10 = vand.u32 4294901760, %v116_v4  ;;  %v70_v12 = vmul.f32 %v62_v8, %v62_v8  ;;  %v61_v15 = vld [vmem:[#allocation6 + $0x28] sm:$0xff]  ;;  %v1549_v18 = vand.u32 4294901760, %v119_v11  ;;  %s1387_s13 = sshll.u32 %s2036_s5, 4  ;;  %s1388_s13 = int_to_ptr.hbm [resolvable:$true] %s1387_s13 }
   0xe   :  { %418 = vmatpush.msrb.mxu0 %v1489_v0  ;;  %v88_v6 = vmul.f32 %v80_v3, %v80_v3  ;;  %v87_v13 = vmul.f32 %v79_v9, %v79_v9  ;;  %v78_v16 = vld [vmem:[#allocation6 + $0x68] sm:$0xff]  ;;  %v69_v19 = vmul.f32 %v61_v15, %v61_v15  ;;  %v122_v22 = vsel %vm114_vm0, %v108_v14, 0  ;;  %v60_v24 = vld [vmem:[#allocation6 + $0x20] sm:$0xff]  ;;  %v109_v39 = vld [vmem:[%s2032_s1 + $0x18] sm:$0xff] }
   0xf   :  { %468 = vmatpush.msrb.mxu1 %v1489_v0  ;;  %v157_v20 = vsub.f32 %v116_v4, %v1543_v10  ;;  %v86_v23 = vmul.f32 %v78_v16, %v78_v16  ;;  %v77_v25 = vld [vmem:[#allocation6 + $0x60] sm:$0xff]  ;;  %v165_v27 = vsub.f32 %v119_v11, %v1549_v18  ;;  %v68_v28 = vmul.f32 %v60_v24, %v60_v24  ;;  %v59_v52 = vld [vmem:[#allocation6 + $0x18] sm:$0xff]  ;;  %v58_v11 = vld [vmem:[#allocation6 + $0x10] sm:$0xff] }
  0x10   :  { %v96_v17 = vadd.f32 %v88_v6, %v71_v5  ;;  %243 = vmatmul.f32.vlgmr.msra.gmra.mxu1 %v1543_v10  ;;  %v95_v21 = vadd.f32 %v87_v13, %v70_v12  ;;  %v1563_v33 = vand.u32 4294901760, %v122_v22  ;;  %v85_v34 = vmul.f32 %v77_v25, %v77_v25  ;;  %v76_v53 = vld [vmem:[#allocation6 + $0x58] sm:$0xff]  ;;  %v75_v12 = vld [vmem:[#allocation6 + $0x50] sm:$0xff] }
  0x11   :  { %295 = vmatmul.f32.vlgmr.msra.gmra.mxu2 %v157_v20  ;;  %v158_v29 = vand.u32 4294901760, %v157_v20  ;;  %v94_v31 = vadd.f32 %v86_v23, %v69_v19  ;;  %v166_v36 = vand.u32 4294901760, %v165_v27  ;;  %v125_v46 = vsel %vm114_vm0, %v109_v39, 0  ;;  %v110_v4 = vld [vmem:[%s2032_s1 + $0x20] sm:$0xff]  ;;  %v74_v19 = vld [vmem:[#allocation6 + $0x48] sm:$0xff]  ;;  %v111_v39 = vld [vmem:[%s2032_s1 + $0x28] sm:$0xff] }
  0x12   :  { %v1554_v26 = vand.u32 4294901760, %v96_v17  ;;  %v1557_v30 = vand.u32 4294901760, %v95_v21  ;;  %v93_v41 = vadd.f32 %v85_v34, %v68_v28  ;;  %v173_v50 = vsub.f32 %v122_v22, %v1563_v33  ;;  %v56_v28 = vld [vmem:[#allocation6] sm:$0xff] }
  0x13   :  { %v159_v35 = vsub.f32 %v157_v20, %v158_v29  ;;  %354 = vmatmul.f32.vlgmr.msra.gmra.mxu3 %v158_v29  ;;  %v1569_v38 = vand.u32 4294901760, %v94_v31  ;;  %v167_v48 = vsub.f32 %v165_v27, %v166_v36  ;;  %v67_v58 = vmul.f32 %v59_v52, %v59_v52  ;;  %v73_v29 = vld [vmem:[#allocation6 + $0x40] sm:$0xff] }
  0x14   :  { %536 = vmatpush.msrb.mxu2 %v1554_v26  ;;  %v1561_v32 = vsub.f32 %v96_v17, %v1554_v26  ;;  %787 = vmatpush.msra.mxu1 %v1554_v26  ;;  %v1567_v37 = vsub.f32 %v95_v21, %v1557_v30  ;;  %v1589_v47 = vand.u32 4294901760, %v93_v41  ;;  %v84_v59 = vmul.f32 %v76_v53, %v76_v53  ;;  %v57_v17 = vld [vmem:[#allocation6 + $0x8] sm:$0xff] }
  0x15   :  { %v160_v42 = vand.u32 4294901760, %v159_v35  ;;  %v1583_v44 = vsub.f32 %v94_v31, %v1569_v38  ;;  %v1612_v60 = vand.u32 4294901760, %v125_v46  ;;  %v168_v62 = vand.u32 4294901760, %v167_v48 }
  0x16   :  { %v1575_v40 = vand.u32 4294901760, %v1561_v32  ;;  %538 = vmatpush.msrb.mxu2 %v1557_v30  ;;  %789 = vmatpush.msra.mxu1 %v1557_v30  ;;  %v1580_v43 = vand.u32 4294901760, %v1567_v37  ;;  %v1603_v55 = vsub.f32 %v93_v41, %v1589_v47  ;;  %v174_v63 = vand.u32 4294901760, %v173_v50 }
  0x17   :  { %161 = vmatmul.f32.vlgmr.msra.gmra.mxu0 %v160_v42  ;;  %v1597_v51 = vand.u32 4294901760, %v1583_v44  ;;  %v92_v2 = vadd.f32 %v84_v59, %v67_v58  ;;  %v181_v8 = vsub.f32 %v125_v46, %v1612_v60  ;;  %v128_v13 = vsel %vm114_vm0, %v110_v4, 0 }
  0x18   :  { %v627_v45 = vsub.f32 %v1561_v32, %v1575_v40  ;;  %540 = vmatpush.msrb.mxu2 %v1569_v38  ;;  %791 = vmatpush.msra.mxu1 %v1569_v38  ;;  %v633_v49 = vsub.f32 %v1567_v37, %v1580_v43  ;;  %v1615_v61 = vand.u32 4294901760, %v1603_v55  ;;  %v175_v7 = vsub.f32 %v173_v50, %v174_v63 }
  0x19   :  { %247 = vmatmul.f32.gmra.mxu1 %v1549_v18  ;;  %715 = vmatpush.msra.mxu0 %v1561_v32  ;;  %v639_v57 = vsub.f32 %v1583_v44, %v1597_v51  ;;  %v1627_v5 = vand.u32 4294901760, %v92_v2  ;;  %v66_v14 = vmul.f32 %v58_v11, %v58_v11  ;;  %v83_v15 = vmul.f32 %v75_v12, %v75_v12 }
  0x1a   :  { %v1599_v54 = vand.u32 4294901760, %v627_v45  ;;  %542 = vmatpush.msrb.mxu2 %v1589_v47  ;;  %v1606_v56 = vand.u32 4294901760, %v633_v49  ;;  %793 = vmatpush.msra.mxu1 %v1589_v47  ;;  %v645_v3 = vsub.f32 %v1603_v55, %v1615_v61  ;;  %v65_v21 = vmul.f32 %v57_v17, %v57_v17 }
  0x1b   :  { %300 = vmatmul.f32.gmra.mxu2 %v165_v27  ;;  %718 = vmatpush.msra.mxu0 %v1567_v37  ;;  %v1618_v1 = vand.u32 4294901760, %v639_v57  ;;  %v1636_v9 = vsub.f32 %v92_v2, %v1627_v5  ;;  %v91_v20 = vadd.f32 %v83_v15, %v66_v14  ;;  %v82_v22 = vmul.f32 %v74_v19, %v74_v19 }
  0x1c   :  { %629 = vmatpush.msrb.mxu3 %v1599_v54  ;;  %v1630_v6 = vand.u32 4294901760, %v645_v3  ;;  %544 = vmatpush.msrb.mxu2 %v1627_v5  ;;  %v176_v23 = vand.u32 4294901760, %v175_v7  ;;  %v182_v24 = vand.u32 4294901760, %v181_v8  ;;  %v1646_v25 = vand.u32 4294901760, %v128_v13 }
  0x1d   :  { %360 = vmatmul.f32.gmra.mxu3 %v166_v36  ;;  %721 = vmatpush.msra.mxu0 %v1583_v44  ;;  %v1642_v16 = vand.u32 4294901760, %v1636_v9  ;;  %v1650_v31 = vand.u32 4294901760, %v91_v20  ;;  %v90_v34 = vadd.f32 %v82_v22, %v65_v21  ;;  %v64_v35 = vmul.f32 %v56_v28, %v56_v28  ;;  %v98_v28 = vld [vmem:[%s2031_s0] sm:$0xff] }
  0x1e   :  { %635 = vmatpush.msrb.mxu3 %v1606_v56  ;;  %795 = vmatpush.msra.mxu1 %v1627_v5  ;;  %v81_v41 = vmul.f32 %v73_v29, %v73_v29  ;;  %v183_v46 = vsub.f32 %v181_v8, %v182_v24  ;;  %v189_v48 = vsub.f32 %v128_v13, %v1646_v25 }
  0x1f   :  { %724 = vmatpush.msra.mxu0 %v1603_v55  ;;  %v651_v27 = vsub.f32 %v1636_v9, %v1642_v16  ;;  %546 = vmatpush.msrb.mxu2 %v1650_v31  ;;  %v1659_v42 = vsub.f32 %v91_v20, %v1650_v31  ;;  %v1661_v45 = vand.u32 4294901760, %v90_v34 }
  0x20   :  { %641 = vmatpush.msrb.mxu3 %v1618_v1  ;;  %169 = vmatmul.f32.gmra.mxu0 %v168_v62  ;;  %v89_v49 = vadd.f32 %v81_v41, %v64_v35  ;;  %v184_v62 = vand.u32 4294901760, %v183_v46 }
  0x21   :  { %251 = vmatmul.f32.gmra.mxu1 %v1563_v33  ;;  %727 = vmatpush.msra.mxu0 %v1636_v9  ;;  %v1652_v36 = vand.u32 4294901760, %v651_v27  ;;  %v1669_v52 = vand.u32 4294901760, %v1659_v42  ;;  %v1673_v53 = vsub.f32 %v90_v34, %v1661_v45  ;;  %v504_v34 = vsel %vm502_vm1, %v98_v28, 0 }
  0x22   :  { %647 = vmatpush.msrb.mxu3 %v1630_v6  ;;  %797 = vmatpush.msra.mxu1 %v1650_v31  ;;  %v1675_v57 = vand.u32 4294901760, %v89_v49  ;;  %v1741_v46 = vand.u32 4294901760, %v504_v34 }
  0x23   :  { %305 = vmatmul.f32.gmra.mxu2 %v173_v50  ;;  %v131_v50 = vsel %vm114_vm0, %v111_v39, 0  ;;  %730 = vmatpush.msra.mxu0 %v1659_v42  ;;  %v657_v58 = vsub.f32 %v1659_v42, %v1669_v52  ;;  %v1681_v59 = vand.u32 4294901760, %v1673_v53 }
  0x24   :  { %653 = vmatpush.msrb.mxu3 %v1652_v36  ;;  %548 = vmatpush.msrb.mxu2 %v1661_v45  ;;  %v1684_v2 = vand.u32 4294901760, %v131_v50  ;;  %v1688_v3 = vsub.f32 %v89_v49, %v1675_v57 }
  0x25   :  { %366 = vmatmul.f32.gmra.mxu3 %v174_v63  ;;  %799 = vmatpush.msra.mxu1 %v1661_v45  ;;  %v190_v63 = vand.u32 4294901760, %v189_v48  ;;  %v1690_v4 = vand.u32 4294901760, %v657_v58  ;;  %v663_v7 = vsub.f32 %v1673_v53, %v1681_v59  ;;  %v1751_v58 = vsub.f32 %v504_v34, %v1741_v46 }
  0x26   :  { %550 = vmatpush.msrb.mxu2 %v1675_v57  ;;  %733 = vmatpush.msra.mxu0 %v1673_v53  ;;  %v1700_v11 = vand.u32 4294901760, %v1688_v3  ;;  %v197_v14 = vsub.f32 %v131_v50, %v1684_v2  ;;  %v99_v50 = vld [vmem:[%s2031_s0 + $0x8] sm:$0xff] }
  0x27   :  { %801 = vmatpush.msra.mxu1 %v1675_v57  ;;  %659 = vmatpush.msrb.mxu3 %v1690_v4  ;;  %v1704_v12 = vand.u32 4294901760, %v663_v7  ;;  %v191_v13 = vsub.f32 %v189_v48, %v190_v63 }
  0x28   :  { %177 = vmatmul.f32.gmra.mxu0 %v176_v23  ;;  %862 = vmatpush.msra.mxu2 %v1575_v40  ;;  %v669_v15 = vsub.f32 %v1688_v3, %v1700_v11  ;;  %v198_v21 = vand.u32 4294901760, %v197_v14  ;;  %v113_v23 = vld [vmem:[%s2032_s1 + $0x38] sm:$0xff] }
  0x29   :  { %255 = vmatmul.f32.gmra.mxu1 %v1612_v60  ;;  %665 = vmatpush.msrb.mxu3 %v1704_v12  ;;  %v192_v20 = vand.u32 4294901760, %v191_v13  ;;  %v137_v29 = vsel %vm114_vm0, %v113_v23, 0 }
  0x2a   :  { %866 = vmatpush.msra.mxu2 %v1580_v43  ;;  %v1714_v19 = vand.u32 4294901760, %v669_v15  ;;  %736 = vmatpush.msra.mxu0 %v1688_v3  ;;  %v1738_v41 = vand.u32 4294901760, %v137_v29  ;;  %v100_v15 = vld [vmem:[%s2031_s0 + $0x10] sm:$0xff] }
  0x2b   :  { %310 = vmatmul.f32.gmra.mxu2 %v181_v8  ;;  %v112_v8 = vld [vmem:[%s2032_s1 + $0x30] sm:$0xff] }
  0x2c   :  { %v134_v17 = vsel %vm114_vm0, %v112_v8, 0  ;;  %870 = vmatpush.msra.mxu2 %v1597_v51  ;;  %671 = vmatpush.msrb.mxu3 %v1714_v19  ;;  %v213_v49 = vsub.f32 %v137_v29, %v1738_v41  ;;  %v553_v8 = vand.u32 4294901760, %v1751_v58  ;;  %v101_v29 = vld [vmem:[%s2031_s0 + $0x18] sm:$0xff] }
  0x2d   :  { %372 = vmatmul.f32.gmra.mxu3 %v182_v24  ;;  %v1718_v22 = vand.u32 4294901760, %v134_v17  ;;  %v199_v24 = vsub.f32 %v197_v14, %v198_v21 }
  0x2e   :  { %874 = vmatpush.msra.mxu2 %v1615_v61  ;;  %933 = vmatpush.msra.mxu3 %v1554_v26  ;;  %v214_v7 = vand.u32 4294901760, %v213_v49 }
  0x2f   :  { %v205_v27 = vsub.f32 %v134_v17, %v1718_v22  ;;  %v200_v35 = vand.u32 4294901760, %v199_v24  ;;  %v554_v17 = vsub.f32 %v1751_v58, %v553_v8 }
  0x30   :  { %185 = vmatmul.f32.gmra.mxu0 %v184_v62  ;;  %878 = vmatpush.msra.mxu2 %v1642_v16  ;;  %v507_v62 = vsel %vm502_vm1, %v99_v50, 0 }
  0x31   :  { %259 = vmatmul.f32.gmra.mxu1 %v1646_v25  ;;  %935 = vmatpush.msra.mxu3 %v1557_v30  ;;  %v206_v39 = vand.u32 4294901760, %v205_v27  ;;  %v1757_v13 = vand.u32 4294901760, %v507_v62  ;;  %v555_v24 = vand.u32 4294901760, %v554_v17 }
  0x32   :  { %882 = vmatpush.msra.mxu2 %v1669_v52 }
  0x33   :  { %315 = vmatmul.f32.gmra.mxu2 %v189_v48  ;;  %937 = vmatpush.msra.mxu3 %v1569_v38  ;;  %v207_v48 = vsub.f32 %v205_v27, %v206_v39 }
  0x34   :  { %886 = vmatpush.msra.mxu2 %v1681_v59 }
  0x35   :  { %378 = vmatmul.f32.gmra.mxu3 %v190_v63  ;;  %v208_v63 = vand.u32 4294901760, %v207_v48 }
  0x36   :  { %890 = vmatpush.msra.mxu2 %v1700_v11  ;;  %939 = vmatpush.msra.mxu3 %v1589_v47 }
  0x38   :  { %193 = vmatmul.f32.gmra.mxu0 %v192_v20  ;;  %941 = vmatpush.msra.mxu3 %v1627_v5  ;;  %v1767_v20 = vsub.f32 %v507_v62, %v1757_v13 }
  0x39   :  { %263 = vmatmul.f32.gmra.mxu1 %v1684_v2 }
  0x3a   :  { %943 = vmatpush.msra.mxu3 %v1650_v31 }
  0x3b   :  { %320 = vmatmul.f32.gmra.mxu2 %v197_v14  ;;  %v215_v14 = vsub.f32 %v213_v49, %v214_v7 }
  0x3c   :  { %945 = vmatpush.msra.mxu3 %v1661_v45 }
  0x3d   :  { %384 = vmatmul.f32.gmra.mxu3 %v198_v21  ;;  %v510_v21 = vsel %vm502_vm1, %v100_v15, 0  ;;  %v216_v23 = vand.u32 4294901760, %v215_v14 }
  0x3e   :  { %947 = vmatpush.msra.mxu3 %v1675_v57  ;;  %v1771_v28 = vand.u32 4294901760, %v510_v21 }
  0x40   :  { %201 = vmatmul.f32.gmra.mxu0 %v200_v35  ;;  %v1782_v35 = vsub.f32 %v510_v21, %v1771_v28 }
  0x41   :  { %267 = vmatmul.f32.gmra.mxu1 %v1718_v22 }
  0x42   :  { %v569_v48 = vand.u32 4294901760, %v1782_v35 }
  0x43   :  { %325 = vmatmul.f32.gmra.mxu2 %v205_v27  ;;  %v561_v27 = vand.u32 4294901760, %v1767_v20 }
  0x45   :  { %390 = vmatmul.f32.gmra.mxu3 %v206_v39  ;;  %v562_v34 = vsub.f32 %v1767_v20, %v561_v27  ;;  %v513_v39 = vsel %vm502_vm1, %v101_v29, 0 }
  0x48   :  { %209 = vmatmul.f32.gmra.mxu0 %v208_v63 }
  0x49   :  { %271 = vmatmul.f32.gmra.mxu1 %v1738_v41 }
  0x4b   :  { %330 = vmatmul.f32.gmra.mxu2 %v213_v49  ;;  %v1791_v49 = vand.u32 4294901760, %v513_v39 }
  0x4d   :  { %396 = vmatmul.f32.gmra.mxu3 %v214_v7  ;;  %v105_v7 = vld [vmem:[%s2031_s0 + $0x38] sm:$0xff] }
  0x4e   :  { %v525_v17 = vsel %vm502_vm1, %v105_v7, 0 }
  0x50   :  { %217 = vmatmul.f32.gmra.mxu0 %v216_v23  ;;  %v1882_v23 = vand.u32 4294901760, %v525_v17 }
  0x51   :  { %470 = vmatmul.f32.vlgmr.msrb.gmra.mxu1 %v1543_v10 }
  0x52   :  { %1032 = vmatpush.msrb.mxu1 %v1599_v54  ;;  %v563_v54 = vand.u32 4294901760, %v562_v34  ;;  %v1890_v29 = vsub.f32 %v525_v17, %v1882_v23 }
  0x53   :  { %556 = vmatmul.f32.vlgmr.msrb.gmra.mxu2 %v555_v24 }
  0x54   :  { %1090 = vmatpush.msrb.mxu2 %v1561_v32  ;;  %1038 = vmatpush.msrb.mxu1 %v1606_v56  ;;  %v102_v32 = vld [vmem:[%s2031_s0 + $0x20] sm:$0xff]  ;;  %v1807_v56 = vsub.f32 %v513_v39, %v1791_v49  ;;  %v609_v39 = vand.u32 4294901760, %v1890_v29 }
  0x55   :  { %673 = vmatmul.f32.vlgmr.msrb.gmra.mxu3 %v1741_v46 }
  0x56   :  { %1127 = vmatpush.msrb.mxu3 %v1554_v26  ;;  %1093 = vmatpush.msrb.mxu2 %v1567_v37  ;;  %v570_v37 = vsub.f32 %v1782_v35, %v569_v48 }
  0x57   :  { %1044 = vmatpush.msrb.mxu1 %v1618_v1  ;;  %v577_v1 = vand.u32 4294901760, %v1807_v56 }
  0x58   :  { %1129 = vmatpush.msrb.mxu3 %v1557_v30  ;;  %1096 = vmatpush.msrb.mxu2 %v1583_v44  ;;  %v571_v44 = vand.u32 4294901760, %v570_v37 }
  0x59   :  { %420 = vmatmul.f32.vlgmr.msrb.gmra.mxu0 %v1543_v10  ;;  %474 = vmatmul.f32.gmra.mxu1 %v1549_v18  ;;  %v516_v10 = vsel %vm502_vm1, %v102_v32, 0 }
  0x5a   :  { %995 = vmatpush.msrb.mxu0 %v1554_v26  ;;  %1131 = vmatpush.msrb.mxu3 %v1569_v38  ;;  %v1818_v50 = vand.u32 4294901760, %v516_v10 }
  0x5b   :  { %564 = vmatmul.f32.gmra.mxu2 %v563_v54  ;;  %1050 = vmatpush.msrb.mxu1 %v1630_v6  ;;  %v578_v6 = vsub.f32 %v1807_v56, %v577_v1 }
  0x5c   :  { %997 = vmatpush.msrb.mxu0 %v1557_v30  ;;  %1099 = vmatpush.msrb.mxu2 %v1603_v55  ;;  %v103_v55 = vld [vmem:[%s2031_s0 + $0x28] sm:$0xff] }
  0x5d   :  { %677 = vmatmul.f32.gmra.mxu3 %v1757_v13  ;;  %1056 = vmatpush.msrb.mxu1 %v1652_v36  ;;  %v579_v36 = vand.u32 4294901760, %v578_v6 }
  0x5e   :  { %999 = vmatpush.msrb.mxu0 %v1569_v38  ;;  %1133 = vmatpush.msrb.mxu3 %v1589_v47 }
  0x5f   :  { %1102 = vmatpush.msrb.mxu2 %v1636_v9  ;;  %1062 = vmatpush.msrb.mxu1 %v1690_v4  ;;  %v1835_v9 = vsub.f32 %v516_v10, %v1818_v50 }
  0x60   :  { %1001 = vmatpush.msrb.mxu0 %v1589_v47  ;;  %1135 = vmatpush.msrb.mxu3 %v1627_v5 }
  0x61   :  { %424 = vmatmul.f32.gmra.mxu0 %v1549_v18  ;;  %478 = vmatmul.f32.gmra.mxu1 %v1563_v33  ;;  %v519_v18 = vsel %vm502_vm1, %v103_v55, 0 }
  0x62   :  { %1003 = vmatpush.msrb.mxu0 %v1627_v5  ;;  %1105 = vmatpush.msrb.mxu2 %v1659_v42  ;;  %v585_v42 = vand.u32 4294901760, %v1835_v9  ;;  %v1846_v4 = vand.u32 4294901760, %v519_v18 }
  0x63   :  { %572 = vmatmul.f32.gmra.mxu2 %v571_v44  ;;  %1137 = vmatpush.msrb.mxu3 %v1650_v31 }
  0x64   :  { %1005 = vmatpush.msrb.mxu0 %v1650_v31  ;;  %1108 = vmatpush.msrb.mxu2 %v1673_v53  ;;  %v104_v53 = vld [vmem:[%s2031_s0 + $0x30] sm:$0xff] }
  0x65   :  { %681 = vmatmul.f32.gmra.mxu3 %v1771_v28  ;;  %1068 = vmatpush.msrb.mxu1 %v1704_v12  ;;  %v586_v12 = vsub.f32 %v1835_v9, %v585_v42 }
  0x66   :  { %1139 = vmatpush.msrb.mxu3 %v1661_v45  ;;  %1007 = vmatpush.msrb.mxu0 %v1661_v45 }
  0x67   :  { %1111 = vmatpush.msrb.mxu2 %v1688_v3  ;;  %1074 = vmatpush.msrb.mxu1 %v1714_v19  ;;  %v1861_v3 = vsub.f32 %v519_v18, %v1846_v4  ;;  %v522_v19 = vsel %vm502_vm1, %v104_v53, 0  ;;  %v587_v62 = vand.u32 4294901760, %v586_v12  ;;  %v981_v12 = vld [vmem:[%s2033_s2] sm:$0xff]  ;;  %s1490_s2 = smov [#allocation8]  }
  0x68   :  { %1141 = vmatpush.msrb.mxu3 %v1675_v57  ;;  %1009 = vmatpush.msrb.mxu0 %v1675_v57  ;;  %v1866_v63 = vand.u32 4294901760, %v522_v19  ;;  %s1385_s10 = sshll.u32 %s1490_s2, 4  ;;  %s1386_s10 = int_to_ptr.vmem [resolvable:$true] %s1385_s10 }
  0x69   :  { %428 = vmatmul.f32.gmra.mxu0 %v1563_v33  ;;  %482 = vmatmul.f32.gmra.mxu1 %v1612_v60  ;;  %v593_v33 = vand.u32 4294901760, %v1861_v3 }
  0x6a   :  { %v1877_v15 = vsub.f32 %v522_v19, %v1866_v63 }
  0x6b   :  { %580 = vmatmul.f32.gmra.mxu2 %v579_v36  ;;  %v594_v14 = vsub.f32 %v1861_v3, %v593_v33 }
  0x6d   :  { %685 = vmatmul.f32.gmra.mxu3 %v1791_v49  ;;  %v595_v21 = vand.u32 4294901760, %v594_v14 }
  0x71   :  { %432 = vmatmul.f32.gmra.mxu0 %v1612_v60  ;;  %486 = vmatmul.f32.gmra.mxu1 %v1646_v25  ;;  %v601_v60 = vand.u32 4294901760, %v1877_v15 }
  0x73   :  { %588 = vmatmul.f32.gmra.mxu2 %v587_v62  ;;  %v602_v24 = vsub.f32 %v1877_v15, %v601_v60  ;;  %v1224_v62 = vsel %vm114_vm0, %v981_v12, 0 }
  0x75   :  { %689 = vmatmul.f32.gmra.mxu3 %v1818_v50  ;;  %v603_v34 = vand.u32 4294901760, %v602_v24 }
  0x79   :  { %436 = vmatmul.f32.gmra.mxu0 %v1646_v25  ;;  %490 = vmatmul.f32.gmra.mxu1 %v1684_v2  ;;  %v610_v25 = vsub.f32 %v1890_v29, %v609_v39 }
  0x7b   :  { %596 = vmatmul.f32.gmra.mxu2 %v595_v21  ;;  %v611_v54 = vand.u32 4294901760, %v610_v25  ;;  %v1243_v21 = vand.u32 4294901760, %v1224_v62 }
  0x7d   :  { %693 = vmatmul.f32.gmra.mxu3 %v1846_v4 }
  0x81   :  { %440 = vmatmul.f32.gmra.mxu0 %v1684_v2  ;;  %494 = vmatmul.f32.gmra.mxu1 %v1718_v22 }
  0x83   :  { %604 = vmatmul.f32.gmra.mxu2 %v603_v34 }
  0x85   :  { %697 = vmatmul.f32.gmra.mxu3 %v1866_v63 }
  0x89   :  { %444 = vmatmul.f32.gmra.mxu0 %v1718_v22  ;;  %498 = vmatmul.f32.gmra.mxu1 %v1738_v41 }
  0x8b   :  { %612 = vmatmul.f32.gmra.mxu2 %v611_v54  ;;  %v1244_v54 = vsub.f32 %v1224_v62, %v1243_v21 }
  0x8d   :  { %701 = vmatmul.f32.gmra.mxu3 %v1882_v23  ;;  %v244_v32 = vpop.f32.mrf.mxu1 }
  0x91   :  { %448 = vmatmul.f32.gmra.mxu0 %v1738_v41  ;;  %805 = vmatmul.f32.vlgmr.msra.gmra.mxu1 %v553_v8 }
  0x92   :  { %1203 = vmatpush.msra.mxu1 %v1554_v26 }
  0x93   :  { %892 = vmatmul.f32.vlgmr.msra.gmra.mxu2 %v1741_v46 }
  0x94   :  { %1242 = vmatpush.msra.mxu2 %v1489_v0  ;;  %1205 = vmatpush.msra.mxu1 %v1557_v30  ;;  %v162_v2 = vpop.f32.mrf.mxu0  ;;  %v296_v22 = vpop.f32.mrf.mxu2 }
  0x95   :  { %949 = vmatmul.f32.vlgmr.msra.gmra.mxu3 %v1741_v46  ;;  %v245_v41 = vadd.f32 %v244_v32, %v162_v2 }
  0x96   :  { %1272 = vmatpush.msra.mxu3 %v1489_v0  ;;  %1207 = vmatpush.msra.mxu1 %v1569_v38  ;;  %v248_v37 = vpop.f32.mrf.mxu1  ;;  %v355_v10 = vpop.f32.mrf.mxu3 }
  0x97   :  { %v297_v26 = vadd.f32 %v296_v22, %v245_v41 }
  0x98   :  { %1209 = vmatpush.msra.mxu1 %v1589_v47 }
  0x99   :  { %739 = vmatmul.f32.vlgmr.msra.gmra.mxu0 %v1751_v58  ;;  %811 = vmatmul.f32.gmra.mxu1 %v561_v27  ;;  %v1919_v30 = vadd.f32 %v355_v10, %v297_v26 }
  0x9a   :  { %1160 = vmatpush.msra.mxu0 %v1575_v40  ;;  %1211 = vmatpush.msra.mxu1 %v1627_v5 }
  0x9b   :  { %896 = vmatmul.f32.gmra.mxu2 %v1757_v13 }
  0x9c   :  { %1164 = vmatpush.msra.mxu0 %v1580_v43  ;;  %1213 = vmatpush.msra.mxu1 %v1650_v31 }
  0x9d   :  { %953 = vmatmul.f32.gmra.mxu3 %v1757_v13  ;;  %v170_v38 = vpop.f32.mrf.mxu0 }
  0x9e   :  { %v301_v47 = vpop.f32.mrf.mxu2  ;;  %1168 = vmatpush.msra.mxu0 %v1597_v51  ;;  %1215 = vmatpush.msra.mxu1 %v1661_v45  ;;  %v249_v46 = vadd.f32 %v248_v37, %v170_v38  ;;  %v252_v40 = vpop.f32.mrf.mxu1  ;;  %v1245_v37 = vand.u32 4294901760, %v1244_v54 }
  0xa0   :  { %v361_v58 = vpop.f32.mrf.mxu3  ;;  %1172 = vmatpush.msra.mxu0 %v1615_v61  ;;  %1217 = vmatpush.msra.mxu1 %v1675_v57  ;;  %v302_v43 = vadd.f32 %v301_v47, %v249_v46  ;;  %v1246_v38 = vsub.f32 %v1244_v54, %v1245_v37 }
  0xa1   :  { %744 = vmatmul.f32.gmra.mxu0 %v1767_v20  ;;  %817 = vmatmul.f32.gmra.mxu1 %v569_v48 }
  0xa2   :  { %1176 = vmatpush.msra.mxu0 %v1642_v16  ;;  %v1933_v5 = vadd.f32 %v361_v58, %v302_v43 }
  0xa3   :  { %900 = vmatmul.f32.gmra.mxu2 %v1771_v28 }
  0xa4   :  { %1180 = vmatpush.msra.mxu0 %v1669_v52 }
  0xa5   :  { %957 = vmatmul.f32.gmra.mxu3 %v1771_v28  ;;  %v178_v51 = vpop.f32.mrf.mxu0 }
  0xa6   :  { %v306_v61 = vpop.f32.mrf.mxu2  ;;  %1184 = vmatpush.msra.mxu0 %v1681_v59  ;;  %v253_v31 = vadd.f32 %v252_v40, %v178_v51  ;;  %v256_v45 = vpop.f32.mrf.mxu1 }
  0xa8   :  { %v367_v57 = vpop.f32.mrf.mxu3  ;;  %1188 = vmatpush.msra.mxu0 %v1700_v11  ;;  %v307_v16 = vadd.f32 %v306_v61, %v253_v31 }
  0xa9   :  { %749 = vmatmul.f32.gmra.mxu0 %v1782_v35  ;;  %823 = vmatmul.f32.gmra.mxu1 %v577_v1 }
  0xaa   :  { %v1943_v8 = vadd.f32 %v367_v57, %v307_v16 }
  0xab   :  { %904 = vmatmul.f32.gmra.mxu2 %v1791_v49 }
  0xad   :  { %961 = vmatmul.f32.gmra.mxu3 %v1791_v49  ;;  %v186_v52 = vpop.f32.mrf.mxu0 }
  0xae   :  { %v311_v13 = vpop.f32.mrf.mxu2  ;;  %v257_v59 = vadd.f32 %v256_v45, %v186_v52  ;;  %v260_v20 = vpop.f32.mrf.mxu1 }
  0xb0   :  { %v373_v27 = vpop.f32.mrf.mxu3  ;;  %v312_v11 = vadd.f32 %v311_v13, %v257_v59 }
  0xb1   :  { %754 = vmatmul.f32.gmra.mxu0 %v1807_v56  ;;  %829 = vmatmul.f32.gmra.mxu1 %v585_v42 }
  0xb2   :  { %v1950_v28 = vadd.f32 %v373_v27, %v312_v11 }
  0xb3   :  { %908 = vmatmul.f32.gmra.mxu2 %v1818_v50 }
  0xb5   :  { %965 = vmatmul.f32.gmra.mxu3 %v1818_v50  ;;  %v194_v35 = vpop.f32.mrf.mxu0 }
  0xb6   :  { %v316_v48 = vpop.f32.mrf.mxu2  ;;  %v261_v49 = vadd.f32 %v260_v20, %v194_v35  ;;  %v264_v44 = vpop.f32.mrf.mxu1 }
  0xb8   :  { %v379_v1 = vpop.f32.mrf.mxu3  ;;  %v317_v55 = vadd.f32 %v316_v48, %v261_v49 }
  0xb9   :  { %759 = vmatmul.f32.gmra.mxu0 %v1835_v9  ;;  %835 = vmatmul.f32.gmra.mxu1 %v593_v33  ;;  %v982_v9 = vld [vmem:[#allocation3] sm:$0xff] }
  0xba   :  { %v1957_v56 = vadd.f32 %v379_v1, %v317_v55 }
  0xbb   :  { %912 = vmatmul.f32.gmra.mxu2 %v1846_v4 }
  0xbd   :  { %969 = vmatmul.f32.gmra.mxu3 %v1846_v4  ;;  %v202_v6 = vpop.f32.mrf.mxu0  ;;  %v984_v4 = vsel %vm502_vm1, %v982_v9, 0 }
  0xbe   :  { %v321_v18 = vpop.f32.mrf.mxu2  ;;  %v265_v50 = vadd.f32 %v264_v44, %v202_v6  ;;  %v268_v36 = vpop.f32.mrf.mxu1  ;;  %v1010_v17 = vand.u32 4294901760, %v984_v4 }
  0xc0   :  { %v385_v42 = vpop.f32.mrf.mxu3  ;;  %v322_v53 = vadd.f32 %v321_v18, %v265_v50  ;;  %v1011_v25 = vsub.f32 %v984_v4, %v1010_v17 }
  0xc1   :  { %764 = vmatmul.f32.gmra.mxu0 %v1861_v3  ;;  %841 = vmatmul.f32.gmra.mxu1 %v601_v60 }
  0xc2   :  { %v1967_v19 = vadd.f32 %v385_v42, %v322_v53  ;;  %v1012_v41 = vand.u32 4294901760, %v1011_v25 }
  0xc3   :  { %916 = vmatmul.f32.gmra.mxu2 %v1866_v63 }
  0xc4   :  { %v1013_v26 = vsub.f32 %v1011_v25, %v1012_v41 }
  0xc5   :  { %973 = vmatmul.f32.gmra.mxu3 %v1866_v63  ;;  %v210_v3 = vpop.f32.mrf.mxu0 }
  0xc6   :  { %v326_v33 = vpop.f32.mrf.mxu2  ;;  %v269_v7 = vadd.f32 %v268_v36, %v210_v3  ;;  %v272_v14 = vpop.f32.mrf.mxu1 }
  0xc8   :  { %v391_v60 = vpop.f32.mrf.mxu3  ;;  %v327_v24 = vadd.f32 %v326_v33, %v269_v7 }
  0xc9   :  { %769 = vmatmul.f32.gmra.mxu0 %v1877_v15  ;;  %847 = vmatmul.f32.gmra.mxu1 %v609_v39 }
  0xca   :  { %v1976_v34 = vadd.f32 %v391_v60, %v327_v24 }
  0xcb   :  { %920 = vmatmul.f32.gmra.mxu2 %v1882_v23 }
  0xcd   :  { %977 = vmatmul.f32.gmra.mxu3 %v1882_v23  ;;  %v218_v63 = vpop.f32.mrf.mxu0  ;;  %v1014_v23 = vand.u32 4294901760, %v1013_v26 }
  0xce   :  { %v331_v32 = vpop.f32.mrf.mxu2  ;;  %v273_v2 = vadd.f32 %v272_v14, %v218_v63  ;;  %v471_v22 = vpop.f32.mrf.mxu1 }
  0xd0   :  { %v397_v10 = vpop.f32.mrf.mxu3  ;;  %v332_v15 = vadd.f32 %v331_v32, %v273_v2 }
  0xd1   :  { %774 = vmatmul.f32.gmra.mxu0 %v1890_v29  ;;  %1076 = vmatmul.f32.vlgmr.msrb.gmra.mxu1 %v1010_v17  ;;  %v1247_v29 = vand.u32 4294901760, %v1246_v38 }
  0xd2   :  { %1366 = vmatpush.msrb.mxu1 %v1489_v0  ;;  %v398_v39 = vadd.f32 %v397_v10, %v332_v15 }
  0xd3   :  { %1114 = vmatmul.f32.vlgmr.msrb.gmra.mxu2 %v1011_v25 }
  0xd4   :  { %1295 = vmatpush.msrb.mxu2 %v1489_v0 }
  0xd5   :  { %1145 = vmatmul.f32.vlgmr.msrb.gmra.mxu3 %v1012_v41 }
  0xd6   :  { %v421_v47 = vpop.f32.mrf.mxu0  ;;  %v557_v46 = vpop.f32.mrf.mxu2  ;;  %1318 = vmatpush.msrb.mxu3 %v1489_v0 }
  0xd7   :  { %v422_v40 = vadd.f32 %v421_v47, %v1919_v30  ;;  %v475_v58 = vpop.f32.mrf.mxu1 }
  0xd8   :  { %v674_v43 = vpop.f32.mrf.mxu3 }
  0xd9   :  { %v472_v51 = vadd.f32 %v471_v22, %v422_v40  ;;  %1015 = vmatmul.f32.vlgmr.msrb.gmra.mxu0 %v1014_v23  ;;  %1219 = vmatmul.f32.vlgmr.msra.gmra.mxu1 %v1010_v17 }
  0xda   :  { %1344 = vmatpush.msrb.mxu0 %v1489_v0 }
  0xdb   :  { %1248 = vmatmul.f32.vlgmr.msra.gmra.mxu2 %v1247_v29  ;;  %v558_v24 = vadd.f32 %v557_v46, %v472_v51 }
  0xdd   :  { %1274 = vmatmul.f32.vlgmr.msra.gmra.mxu3 %v1243_v21 }
  0xde   :  { %v425_v61 = vpop.f32.mrf.mxu0  ;;  %v565_v31 = vpop.f32.mrf.mxu2 }
  0xdf   :  { %v426_v45 = vadd.f32 %v425_v61, %v1933_v5  ;;  %v479_v57 = vpop.f32.mrf.mxu1 }
  0xe0   :  { %v678_v16 = vpop.f32.mrf.mxu3 }
  0xe1   :  { %v476_v52 = vadd.f32 %v475_v58, %v426_v45  ;;  %1190 = vmatmul.f32.vlgmr.msra.gmra.mxu0 %v1010_v17  ;;  %1368 = vmatmul.f32.vlgmr.msrb.gmra.mxu1 %v1243_v21 }
  0xe3   :  { %1298 = vmatmul.f32.vlgmr.msrb.gmra.mxu2 %v1244_v54  ;;  %v675_v54 = vadd.f32 %v674_v43, %v558_v24  ;;  %v566_v41 = vadd.f32 %v565_v31, %v476_v52 }
  0xe5   :  { %1322 = vmatmul.f32.vlgmr.msrb.gmra.mxu3 %v1245_v37  ;;  %v679_v15 = vadd.f32 %v678_v16, %v566_v41 }
  0xe6   :  { %v429_v30 = vpop.f32.mrf.mxu0  ;;  %v573_v13 = vpop.f32.mrf.mxu2 }
  0xe7   :  { %v430_v59 = vadd.f32 %v429_v30, %v1943_v8  ;;  %v483_v20 = vpop.f32.mrf.mxu1 }
  0xe8   :  { %v682_v27 = vpop.f32.mrf.mxu3 }
  0xe9   :  { %v480_v0 = vadd.f32 %v479_v57, %v430_v59  ;;  %1346 = vmatmul.f32.vlgmr.msrb.gmra.mxu0 %v1243_v21 }
  0xeb   :  { %v574_v46 = vadd.f32 %v573_v13, %v480_v0 }
  0xed   :  { %v683_v43 = vadd.f32 %v682_v27, %v574_v46 }
  0xee   :  { %v433_v11 = vpop.f32.mrf.mxu0  ;;  %v581_v35 = vpop.f32.mrf.mxu2 }
  0xef   :  { %v434_v48 = vadd.f32 %v433_v11, %v1950_v28  ;;  %v487_v5 = vpop.f32.mrf.mxu1 }
  0xf0   :  { %v686_v49 = vpop.f32.mrf.mxu3 }
  0xf1   :  { %v484_v44 = vadd.f32 %v483_v20, %v434_v48 }
  0xf3   :  { %v582_v30 = vadd.f32 %v581_v35, %v484_v44 }
  0xf5   :  { %v687_v20 = vadd.f32 %v686_v49, %v582_v30 }
  0xf6   :  { %v437_v1 = vpop.f32.mrf.mxu0  ;;  %v1989_v55 = vpop.f32.mrf.mxu2 }
  0xf7   :  { %v438_v6 = vadd.f32 %v437_v1, %v1957_v56  ;;  %v491_v18 = vpop.f32.mrf.mxu1 }
  0xf8   :  { %v1992_v50 = vpop.f32.mrf.mxu3 }
  0xf9   :  { %v488_v8 = vadd.f32 %v487_v5, %v438_v6 }
  0xfb   :  { %v590_v27 = vadd.f32 %v1989_v55, %v488_v8 }
  0xfe   :  { %v441_v36 = vpop.f32.mrf.mxu0  ;;  %v1994_v42 = vpop.f32.mrf.mxu2 }
  0xff   :  { %v442_v53 = vadd.f32 %v441_v36, %v1967_v19  ;;  %v495_v9 = vpop.f32.mrf.mxu1  ;;  %v691_v36 = vadd.f32 %v1992_v50, %v590_v27 }
 0x100   :  { %v1997_v12 = vpop.f32.mrf.mxu3 }
 0x101   :  { %v1999_v28 = vadd.f32 %v491_v18, %v442_v53 }
 0x106   :  { %v445_v4 = vpop.f32.mrf.mxu0  ;;  %v2001_v62 = vpop.f32.mrf.mxu2 }
 0x107   :  { %v446_v3 = vadd.f32 %v445_v4, %v1976_v34  ;;  %v499_v56 = vpop.f32.mrf.mxu1 }
 0x108   :  { %v2004_v33 = vpop.f32.mrf.mxu3 }
 0x109   :  { %v2006_v7 = vadd.f32 %v495_v9, %v446_v3  ;;  %v598_v3 = vadd.f32 %v1994_v42, %v1999_v28 }
 0x10e   :  { %v449_v14 = vpop.f32.mrf.mxu0  ;;  %v2008_v17 = vpop.f32.mrf.mxu2 }
 0x10f   :  { %v450_v21 = vadd.f32 %v449_v14, %v398_v39  ;;  %v806_v19 = vpop.f32.mrf.mxu1 }
 0x110   :  { %v2010_v60 = vpop.f32.mrf.mxu3 }
 0x111   :  { %v2012_v25 = vadd.f32 %v499_v56, %v450_v21  ;;  %v695_v21 = vadd.f32 %v1997_v12, %v598_v3 }
 0x116   :  { %v740_v63 = vpop.f32.mrf.mxu0  ;;  %v893_v32 = vpop.f32.mrf.mxu2 }
 0x117   :  { %v741_v2 = vadd.f32 %v740_v63, %v675_v54  ;;  %v812_v34 = vpop.f32.mrf.mxu1  ;;  %v606_v63 = vadd.f32 %v2001_v62, %v2006_v7 }
 0x118   :  { %v950_v22 = vpop.f32.mrf.mxu3 }
 0x119   :  { %v807_v37 = vadd.f32 %v806_v19, %v741_v2 }
 0x11b   :  { %v894_v10 = vadd.f32 %v893_v32, %v807_v37 }
 0x11d   :  { %v951_v26 = vadd.f32 %v950_v22, %v894_v10  ;;  %v614_v10 = vadd.f32 %v2008_v17, %v2012_v25 }
 0x11e   :  { %v745_v38 = vpop.f32.mrf.mxu0  ;;  %v897_v23 = vpop.f32.mrf.mxu2 }
 0x11f   :  { %1373 = vst [vmem:[#allocation8] sm:$0xff] %v951_v26  ;;  %v746_v39 = vadd.f32 %v745_v38, %v679_v15  ;;  %v818_v47 = vpop.f32.mrf.mxu1  ;;  %v703_v38 = vadd.f32 %v2010_v60, %v614_v10 }
 0x120   :  { %v954_v40 = vpop.f32.mrf.mxu3 }
 0x121   :  { %v813_v58 = vadd.f32 %v812_v34, %v746_v39  ;;  %v699_v34 = vadd.f32 %v2004_v33, %v606_v63 }
 0x123   :  { %v898_v29 = vadd.f32 %v897_v23, %v813_v58 }
 0x125   :  { %v955_v51 = vadd.f32 %v954_v40, %v898_v29 }
 0x126   :  { %v750_v61 = vpop.f32.mrf.mxu0  ;;  %v901_v45 = vpop.f32.mrf.mxu2 }
 0x127   :  { %1374 = vst [vmem:[#allocation8 + $0x8] sm:$0xff] %v955_v51  ;;  %v751_v57 = vadd.f32 %v750_v61, %v683_v43  ;;  %v824_v31 = vpop.f32.mrf.mxu1 }
 0x128   :  { %v958_v52 = vpop.f32.mrf.mxu3 }
 0x129   :  { %v819_v16 = vadd.f32 %v818_v47, %v751_v57 }
 0x12b   :  { %v902_v59 = vadd.f32 %v901_v45, %v819_v16 }
 0x12d   :  { %v959_v11 = vadd.f32 %v958_v52, %v902_v59 }
 0x12e   :  { %v755_v48 = vpop.f32.mrf.mxu0  ;;  %v905_v5 = vpop.f32.mrf.mxu2 }
 0x12f   :  { %1375 = vst [vmem:[#allocation8 + $0x10] sm:$0xff] %v959_v11  ;;  %v756_v1 = vadd.f32 %v755_v48, %v687_v20  ;;  %v830_v13 = vpop.f32.mrf.mxu1 }
 0x130   :  { %v962_v0 = vpop.f32.mrf.mxu3 }
 0x131   :  { %v825_v6 = vadd.f32 %v824_v31, %v756_v1 }
 0x133   :  { %v906_v18 = vadd.f32 %v905_v5, %v825_v6 }
 0x135   :  { %v963_v53 = vadd.f32 %v962_v0, %v906_v18 }
 0x136   :  { %v760_v9 = vpop.f32.mrf.mxu0  ;;  %v909_v4 = vpop.f32.mrf.mxu2 }
 0x137   :  { %1376 = vst [vmem:[#allocation8 + $0x18] sm:$0xff] %v963_v53  ;;  %v761_v35 = vadd.f32 %v760_v9, %v691_v36  ;;  %v836_v44 = vpop.f32.mrf.mxu1 }
 0x138   :  { %v966_v49 = vpop.f32.mrf.mxu3 }
 0x139   :  { %v831_v56 = vadd.f32 %v830_v13, %v761_v35 }
 0x13b   :  { %v910_v14 = vadd.f32 %v909_v4, %v831_v56 }
 0x13d   :  { %v967_v19 = vadd.f32 %v966_v49, %v910_v14 }
 0x13e   :  { %v765_v55 = vpop.f32.mrf.mxu0  ;;  %v913_v8 = vpop.f32.mrf.mxu2 }
 0x13f   :  { %1377 = vst [vmem:[#allocation8 + $0x20] sm:$0xff] %v967_v19  ;;  %v766_v24 = vadd.f32 %v765_v55, %v695_v21  ;;  %v842_v50 = vpop.f32.mrf.mxu1 }
 0x140   :  { %v970_v54 = vpop.f32.mrf.mxu3 }
 0x141   :  { %v837_v32 = vadd.f32 %v836_v44, %v766_v24 }
 0x143   :  { %v914_v2 = vadd.f32 %v913_v8, %v837_v32 }
 0x145   :  { %v971_v22 = vadd.f32 %v970_v54, %v914_v2 }
 0x146   :  { %v770_v42 = vpop.f32.mrf.mxu0  ;;  %v917_v28 = vpop.f32.mrf.mxu2 }
 0x147   :  { %1378 = vst [vmem:[#allocation8 + $0x28] sm:$0xff] %v971_v22  ;;  %v771_v41 = vadd.f32 %v770_v42, %v699_v34  ;;  %v848_v12 = vpop.f32.mrf.mxu1 }
 0x148   :  { %v974_v37 = vpop.f32.mrf.mxu3 }
 0x149   :  { %v843_v15 = vadd.f32 %v842_v50, %v771_v41 }
 0x14b   :  { %v918_v26 = vadd.f32 %v917_v28, %v843_v15 }
 0x14d   :  { %v975_v23 = vadd.f32 %v974_v37, %v918_v26 }
 0x14e   :  { %v775_v62 = vpop.f32.mrf.mxu0  ;;  %v921_v7 = vpop.f32.mrf.mxu2 }
 0x14f   :  { %1379 = vst [vmem:[#allocation8 + $0x30] sm:$0xff] %v975_v23  ;;  %v776_v39 = vadd.f32 %v775_v62, %v703_v38  ;;  %v1077_v33 = vpop.f32.mrf.mxu1 }
 0x150   :  { %v978_v47 = vpop.f32.mrf.mxu3 }
 0x151   :  { %v849_v40 = vadd.f32 %v848_v12, %v776_v39 }
 0x153   :  { %v922_v46 = vadd.f32 %v921_v7, %v849_v40 }
 0x155   :  { %v979_v17 = vadd.f32 %v978_v47, %v922_v46 }
 0x156   :  { %v1016_v25 = vpop.f32.mrf.mxu0  ;;  %v1115_v60 = vpop.f32.mrf.mxu2 }
 0x157   :  { %1380 = vst [vmem:[#allocation8 + $0x38] sm:$0xff] %v979_v17  ;;  %v1220_v58 = vpop.f32.mrf.mxu1 }
 0x158   :  { %v1146_v29 = vpop.f32.mrf.mxu3  ;;  %1393 = dma.vmem_to_hbm [thread:$0]  %s1386_s10, 1024, %s1388_s13, [#allocation5], %s1487_s28, %s1487_s28, %s1488_s29  }
 0x15e   :  { %v1191_v43 = vpop.f32.mrf.mxu0  ;;  %v1249_v51 = vpop.f32.mrf.mxu2 }
 0x15f   :  { %v1369_v61 = vpop.f32.mrf.mxu1 }
 0x160   :  { %v1275_v45 = vpop.f32.mrf.mxu3 }
 0x166   :  { %v1299_v57 = vpop.f32.mrf.mxu2  ;;  %v1347_v31 = vpop.f32.mrf.mxu0 }
 0x168   :  { %v1323_v52 = vpop.f32.mrf.mxu3 }
 0x169   :  { %1483 = dma.done.wait [#allocation5], 1024  }
 0x16a   :  { %1484 = vsyncadd [#allocation5], 4294966272 }
 0x16b   :  { %1398 = vsyncpa [#allocation4], 1 }
 0x16c   :  { %1399 = vsyncpa [#allocation7], 1 }
 0x16d   :  { %1400 = vsyncpa [#allocation5], 1 }

</bundles_post_ra>
